<compile_context>
chip_gen: v5e
topology: v5e:2x2
jax: 0.10.0
libtpu: 0.0.40
codegen_flags: <defaults>
</compile_context>

<pallas_src>
import functools

import jax
import jax.numpy as jnp
from jax.experimental import pallas as pl
from jax.experimental.pallas import tpu as pltpu


_VMEM_LIMIT_BYTES = 64 * 1024 * 1024   # explicit scoped-VMEM limit (safe on v5e/v6e/v7x)
_TILE_VMEM_BUDGET = 24 * 1024 * 1024   # ~2 in + 1 out, double-buffered, per step


def _pick_row_tile(rows, d_model, itemsize=4, budget_bytes=_TILE_VMEM_BUDGET):
    """Largest row tile (multiple of 8, <=512) dividing `rows` within a VMEM budget."""
    cap = max(8, budget_bytes // (6 * itemsize * max(d_model, 1)))
    for ts in (512, 256, 128, 64, 32, 16, 8):
        if ts <= cap and rows % ts == 0:
            return ts
    return rows  # tiny inputs: block == full array is always legal


def _compiler_params():
    return pltpu.CompilerParams(
        dimension_semantics=("parallel",),       # rows are independent (2 TCs on v7x)
        vmem_limit_bytes=_VMEM_LIMIT_BYTES,
    )


# ---------------------------------------------------------------------------
# Deterministic dropout keep-mask: murmur-style integer hash of the global
# element index mixed with the seed, compared against a uint32 threshold.
# keep probability = 1 - p.  Pure jnp -> lowers on TPU and in interpret mode.
# ---------------------------------------------------------------------------
def _keep_mask(seed, rows, cols, d_model, p):
    idx = rows.astype(jnp.uint32) * jnp.uint32(d_model) + cols.astype(jnp.uint32)
    s = jnp.asarray(seed).astype(jnp.uint32)
    h = idx * jnp.uint32(0x9E3779B1) + s * jnp.uint32(0x85EBCA77)
    h = h ^ (h >> 15)
    h = h * jnp.uint32(0x2C1B3C6D)
    h = h ^ (h >> 12)
    h = h * jnp.uint32(0x297A2D39)
    h = h ^ (h >> 15)
    threshold = jnp.uint32(min(int(round(float(p) * 4294967296.0)), 4294967295))
    return h >= threshold


# ---------------------------------------------------------------------------
# Kernel 1: LayerNorm (PyTorch semantics: gamma*(x-mean)/(std+eps)+beta,
#           biased std, eps added to std — NOT rsqrt(var+eps)).
# Row-tiled over the flattened (B*S, D) row space.
# ---------------------------------------------------------------------------
def _layernorm_kernel(x_ref, gamma_ref, beta_ref, o_ref, *, eps):
    x = x_ref[...].astype(jnp.float32)                       # (TS, D)
    mean = jnp.mean(x, axis=-1, keepdims=True)
    var = jnp.mean(jnp.square(x - mean), axis=-1, keepdims=True)
    inv = 1.0 / (jnp.sqrt(var) + eps)                        # one divide per row
    gamma = gamma_ref[...].astype(jnp.float32)               # (1, D)
    beta = beta_ref[...].astype(jnp.float32)                 # (1, D)
    o_ref[...] = (gamma * ((x - mean) * inv) + beta).astype(o_ref.dtype)


def layernorm(x, gamma, beta, *, eps=1e-5):
    orig_shape = x.shape
    D = orig_shape[-1]
    x2 = x.reshape(-1, D)
    rows = x2.shape[0]
    ts = _pick_row_tile(rows, D)
    out = pl.pallas_call(
        functools.partial(_layernorm_kernel, eps=eps),
        out_shape=jax.ShapeDtypeStruct((rows, D), x.dtype),
        grid_spec=pltpu.PrefetchScalarGridSpec(
            num_scalar_prefetch=0,
            grid=(rows // ts,),
            in_specs=[
                pl.BlockSpec((ts, D), lambda i: (i, 0)),
                pl.BlockSpec((1, D), lambda i: (0, 0)),
                pl.BlockSpec((1, D), lambda i: (0, 0)),
            ],
            out_specs=pl.BlockSpec((ts, D), lambda i: (i, 0)),
        ),
        compiler_params=_compiler_params(),
    )(x2, gamma.reshape(1, D), beta.reshape(1, D))
    return out.reshape(orig_shape)


# ---------------------------------------------------------------------------
# Kernel 2: residual add + dropout:  out = x + dropout(y, p)
# (generic path, used when the sublayer is an arbitrary callable)
# ---------------------------------------------------------------------------
def _residual_dropout_kernel(seed_ref, x_ref, y_ref, o_ref, *, p, d_model, tile_rows):
    x = x_ref[...]                                           # (TS, D), native dtype
    y = y_ref[...]
    if p > 0.0:
        row0 = pl.program_id(0) * tile_rows
        rows = row0 + jax.lax.broadcasted_iota(jnp.int32, y.shape, 0)
        cols = jax.lax.broadcasted_iota(jnp.int32, y.shape, 1)
        keep = _keep_mask(seed_ref[0], rows, cols, d_model, p)
        y = jnp.where(keep, y * (1.0 / (1.0 - p)), jnp.zeros_like(y))
    o_ref[...] = (x + y).astype(o_ref.dtype)


def residual_dropout_add(x, y, *, p, seed):
    orig_shape = x.shape
    D = orig_shape[-1]
    x2 = x.reshape(-1, D)
    y2 = y.reshape(-1, D).astype(x.dtype)
    rows = x2.shape[0]
    ts = _pick_row_tile(rows, D)
    seed_arr = jnp.array([seed], dtype=jnp.int32)
    out = pl.pallas_call(
        functools.partial(_residual_dropout_kernel, p=float(p), d_model=D, tile_rows=ts),
        out_shape=jax.ShapeDtypeStruct((rows, D), x.dtype),
        grid_spec=pltpu.PrefetchScalarGridSpec(
            num_scalar_prefetch=1,                            # seed -> SMEM
            grid=(rows // ts,),
            in_specs=[
                pl.BlockSpec((ts, D), lambda i, seed: (i, 0)),
                pl.BlockSpec((ts, D), lambda i, seed: (i, 0)),
            ],
            out_specs=pl.BlockSpec((ts, D), lambda i, seed: (i, 0)),
        ),
        compiler_params=_compiler_params(),
    )(seed_arr, x2, y2)
    return out.reshape(orig_shape)


# ---------------------------------------------------------------------------
# Kernel 3 (fused fast path for linear sublayers):
#   out = x + dropout(LayerNorm(x) @ W + b)
# One pallas_call: LN prologue, MXU matmul, dropout + residual epilogue.
# Removes the HBM round-trips for both LN(x) and the sublayer output.
# ---------------------------------------------------------------------------
def _fused_kernel(seed_ref, x_ref, gamma_ref, beta_ref, w_ref, b_ref, o_ref,
                  *, eps, p, d_model, tile_rows):
    xf = x_ref[...].astype(jnp.float32)                      # (TS, D)
    mean = jnp.mean(xf, axis=-1, keepdims=True)
    var = jnp.mean(jnp.square(xf - mean), axis=-1, keepdims=True)
    inv = 1.0 / (jnp.sqrt(var) + eps)                        # one divide per row
    normed = (gamma_ref[...].astype(jnp.float32) * ((xf - mean) * inv)
              + beta_ref[...].astype(jnp.float32))
    y = jnp.dot(normed.astype(w_ref.dtype), w_ref[...],
                preferred_element_type=jnp.float32)
    y = y + b_ref[...].astype(jnp.float32)
    if p > 0.0:
        row0 = pl.program_id(0) * tile_rows
        rows = row0 + jax.lax.broadcasted_iota(jnp.int32, y.shape, 0)
        cols = jax.lax.broadcasted_iota(jnp.int32, y.shape, 1)
        keep = _keep_mask(seed_ref[0], rows, cols, d_model, p)
        y = jnp.where(keep, y * (1.0 / (1.0 - p)), 0.0)
    o_ref[...] = (xf + y).astype(o_ref.dtype)


def fused_residual_linear(x, gamma, beta, W, b, *, p, seed, eps=1e-5):
    orig_shape = x.shape
    D = orig_shape[-1]
    assert W.shape == (D, D), "residual requires a square D->D linear sublayer"
    x2 = x.reshape(-1, D)
    rows = x2.shape[0]
    ts = _pick_row_tile(rows, D)
    seed_arr = jnp.array([seed], dtype=jnp.int32)
    out = pl.pallas_call(
        functools.partial(_fused_kernel, eps=eps, p=float(p), d_model=D, tile_rows=ts),
        out_shape=jax.ShapeDtypeStruct((rows, D), x.dtype),
        grid_spec=pltpu.PrefetchScalarGridSpec(
            num_scalar_prefetch=1,                            # seed -> SMEM
            grid=(rows // ts,),
            in_specs=[
                pl.BlockSpec((ts, D), lambda i, seed: (i, 0)),   # x tile
                pl.BlockSpec((1, D), lambda i, seed: (0, 0)),    # gamma
                pl.BlockSpec((1, D), lambda i, seed: (0, 0)),    # beta
                pl.BlockSpec((D, D), lambda i, seed: (0, 0)),    # W (resident)
                pl.BlockSpec((1, D), lambda i, seed: (0, 0)),    # bias
            ],
            out_specs=pl.BlockSpec((ts, D), lambda i, seed: (i, 0)),
        ),
        compiler_params=_compiler_params(),
    )(seed_arr, x2, gamma.reshape(1, D), beta.reshape(1, D), W, b.reshape(1, D))
    return out.reshape(orig_shape)


# ---------------------------------------------------------------------------
# Residual module:  x + dropout(sublayer(norm(x)))
# ---------------------------------------------------------------------------
class LinearSublayer:
    """Simple D->D linear sublayer; Residual fuses it into a single kernel."""

    def __init__(self, W, b):
        self.W = W
        self.b = b

    def __call__(self, h):
        return jnp.einsum("...d,de->...e", h, self.W) + self.b


class Residual:
    def __init__(self, size, dropout, *, eps=1e-5):
        self.size = size
        self.p = float(dropout)
        self.eps = eps
        self.gamma = jnp.ones((size,), jnp.float32)
        self.beta = jnp.zeros((size,), jnp.float32)

    def __call__(self, x, sublayer, *, seed=0):
        if isinstance(sublayer, LinearSublayer):
            # Fully fused path: LN + matmul + dropout + residual in one kernel.
            return fused_residual_linear(x, self.gamma, self.beta,
                                         sublayer.W, sublayer.b,
                                         p=self.p, seed=seed, eps=self.eps)
        # TODO(synk): arbitrary sublayer callables cannot be fused into the
        # Pallas matmul epilogue; they take this two-kernel fallback path.
        normed = layernorm(x, self.gamma, self.beta, eps=self.eps)
        y = sublayer(normed)
        return residual_dropout_add(x, y, p=self.p, seed=seed)


if __name__ == "__main__":
    B, S, D = 2, 8, 128   # lane-dense d_model (multiple of 128)
    key = jax.random.PRNGKey(0)
    kx, kw, kb = jax.random.split(key, 3)

    x = jax.random.normal(kx, (B, S, D), dtype=jnp.float32)
    W = jax.random.normal(kw, (D, D), dtype=jnp.float32) * 0.02
    b = jax.random.normal(kb, (D,), dtype=jnp.float32) * 0.02
    sublayer = LinearSublayer(W, b)

    def ln_ref(xx, gamma, beta, eps):
        mean = xx.mean(-1, keepdims=True)
        std = jnp.sqrt(((xx - mean) ** 2).mean(-1, keepdims=True))
        return gamma * (xx - mean) / (std + eps) + beta

    res_eval = Residual(D, dropout=0.0)

    # --- strict checks on the standalone kernels -------------------------------
    ln_out = jax.block_until_ready(layernorm(x, res_eval.gamma, res_eval.beta,
                                             eps=res_eval.eps))
    assert jnp.allclose(ln_out, ln_ref(x, res_eval.gamma, res_eval.beta, res_eval.eps),
                        atol=1e-5, rtol=1e-5), "layernorm mismatch"

    y0 = sublayer(ln_out)
    add_out = jax.block_until_ready(residual_dropout_add(x, y0, p=0.0, seed=0))
    assert jnp.allclose(add_out, x + y0, atol=1e-6, rtol=1e-6), "residual add mismatch"

    # --- fused path, eval mode (dropout disabled) -------------------------------
    ref_eval = x + (jnp.einsum("bsd,de->bse",
                               ln_ref(x, res_eval.gamma, res_eval.beta, res_eval.eps),
                               W) + b)
    out_fused = jax.block_until_ready(res_eval(x, sublayer))
    assert jnp.allclose(out_fused, ref_eval, atol=2e-2, rtol=2e-2), "fused eval mismatch"

    # --- generic (two-kernel) path with an arbitrary callable -------------------
    out_generic = jax.block_until_ready(res_eval(x, lambda h: sublayer(h)))
    assert jnp.allclose(out_generic, ref_eval, atol=2e-2, rtol=2e-2), "generic path mismatch"

    # --- training mode: dropout active, exact mask reproduced in plain JAX ------
    p, seed = 0.1, 1234
    res_train = Residual(D, dropout=p)
    out_train = jax.block_until_ready(res_train(x, sublayer, seed=seed))
    y_ref = jnp.einsum("bsd,de->bse",
                       ln_ref(x, res_train.gamma, res_train.beta, res_train.eps), W) + b
    rows_idx = jax.lax.broadcasted_iota(jnp.int32, (B * S, D), 0)
    cols_idx = jax.lax.broadcasted_iota(jnp.int32, (B * S, D), 1)
    keep = _keep_mask(jnp.int32(seed), rows_idx, cols_idx, D, p).reshape(B, S, D)
    ref_train = x + jnp.where(keep, y_ref / (1.0 - p), 0.0)
    assert out_train.shape == (B, S, D)
    assert jnp.allclose(out_train, ref_train, atol=2e-2, rtol=2e-2), "fused train mismatch"

    print("KERNEL_OK")
</pallas_src>

<mosaic_0001>
module attributes {stable_mosaic.version = 11 : i64} {
  func.func @_layernorm_kernel(%arg0: i32, %arg1: memref<16x128xf32, #tpu.memory_space<vmem>>, %arg2: memref<1x128xf32, #tpu.memory_space<vmem>>, %arg3: memref<1x128xf32, #tpu.memory_space<vmem>>, %arg4: memref<16x128xf32, #tpu.memory_space<vmem>>) attributes {dimension_semantics = [#tpu.dimension_semantics<parallel>], iteration_bounds = array<i64: 1>, scalar_prefetch = 0 : i64, scratch_operands = 0 : i64, tpu.core_type = #tpu.core_type<tc>, window_params = [{transform_indices = @transform_0, window_bounds = array<i64: 16, 128>}, {pipeline_mode = #tpu.pipeline_mode<synchronous>, transform_indices = @transform_1, window_bounds = array<i64: 1, 128>}, {pipeline_mode = #tpu.pipeline_mode<synchronous>, transform_indices = @transform_2, window_bounds = array<i64: 1, 128>}, {transform_indices = @transform_3, window_bounds = array<i64: 16, 128>}]} {
    %c0 = arith.constant 0 : index
    %c0_0 = arith.constant 0 : index
    %0 = vector.load %arg1[%c0, %c0_0] : memref<16x128xf32, #tpu.memory_space<vmem>>, vector<16x128xf32>
    %cst = arith.constant dense<0.000000e+00> : vector<16xf32>
    %1 = vector.multi_reduction <add>, %0, %cst [1] : vector<16x128xf32> to vector<16xf32>
    %2 = vector.shape_cast %1 : vector<16xf32> to vector<16x1xf32>
    %cst_1 = arith.constant 1.280000e+02 : f32
    %3 = vector.broadcast %cst_1 : f32 to vector<16x1xf32>
    %4 = arith.divf %2, %3 : vector<16x1xf32>
    %5 = vector.broadcast %4 : vector<16x1xf32> to vector<16x128xf32>
    %6 = arith.subf %0, %5 : vector<16x128xf32>
    %7 = arith.mulf %6, %6 : vector<16x128xf32>
    %cst_2 = arith.constant dense<0.000000e+00> : vector<16xf32>
    %8 = vector.multi_reduction <add>, %7, %cst_2 [1] : vector<16x128xf32> to vector<16xf32>
    %9 = vector.shape_cast %8 : vector<16xf32> to vector<16x1xf32>
    %cst_3 = arith.constant 1.280000e+02 : f32
    %10 = vector.broadcast %cst_3 : f32 to vector<16x1xf32>
    %11 = arith.divf %9, %10 : vector<16x1xf32>
    %12 = math.sqrt %11 : vector<16x1xf32>
    %cst_4 = arith.constant 9.99999974E-6 : f32
    %13 = vector.broadcast %cst_4 : f32 to vector<16x1xf32>
    %14 = arith.addf %12, %13 : vector<16x1xf32>
    %cst_5 = arith.constant 1.000000e+00 : f32
    %15 = vector.broadcast %cst_5 : f32 to vector<16x1xf32>
    %16 = arith.divf %15, %14 : vector<16x1xf32>
    %c0_6 = arith.constant 0 : index
    %c0_7 = arith.constant 0 : index
    %17 = vector.load %arg2[%c0_6, %c0_7] : memref<1x128xf32, #tpu.memory_space<vmem>>, vector<1x128xf32>
    %c0_8 = arith.constant 0 : index
    %c0_9 = arith.constant 0 : index
    %18 = vector.load %arg3[%c0_8, %c0_9] : memref<1x128xf32, #tpu.memory_space<vmem>>, vector<1x128xf32>
    %19 = vector.broadcast %4 : vector<16x1xf32> to vector<16x128xf32>
    %20 = arith.subf %0, %19 : vector<16x128xf32>
    %21 = vector.broadcast %16 : vector<16x1xf32> to vector<16x128xf32>
    %22 = arith.mulf %20, %21 : vector<16x128xf32>
    %23 = vector.broadcast %17 : vector<1x128xf32> to vector<16x128xf32>
    %24 = arith.mulf %23, %22 : vector<16x128xf32>
    %25 = vector.broadcast %18 : vector<1x128xf32> to vector<16x128xf32>
    %26 = arith.addf %24, %25 : vector<16x128xf32>
    %c0_10 = arith.constant 0 : index
    %c0_11 = arith.constant 0 : index
    %27 = vector.load %arg4[%c0_10, %c0_11] : memref<16x128xf32, #tpu.memory_space<vmem>>, vector<16x128xf32>
    tpu.vector_store %arg4[%c0_10, %c0_11], %26 {strides = array<i32>} : memref<16x128xf32, #tpu.memory_space<vmem>>, vector<16x128xf32>,
    return
  }
  func.func @transform_0(%arg0: i32) -> (i32, i32) {
    %c0_i32 = arith.constant 0 : i32
    %c0_i32_0 = arith.constant 0 : i32
    return %arg0, %c0_i32 : i32, i32
  }
  func.func @transform_1(%arg0: i32) -> (i32, i32) {
    %c0_i32 = arith.constant 0 : i32
    %c0_i32_0 = arith.constant 0 : i32
    %c0_i32_1 = arith.constant 0 : i32
    return %c0_i32, %c0_i32_0 : i32, i32
  }
  func.func @transform_2(%arg0: i32) -> (i32, i32) {
    %c0_i32 = arith.constant 0 : i32
    %c0_i32_0 = arith.constant 0 : i32
    %c0_i32_1 = arith.constant 0 : i32
    return %c0_i32, %c0_i32_0 : i32, i32
  }
  func.func @transform_3(%arg0: i32) -> (i32, i32) {
    %c0_i32 = arith.constant 0 : i32
    %c0_i32_0 = arith.constant 0 : i32
    return %arg0, %c0_i32 : i32, i32
  }
}

</mosaic_0001>

<bundles_post_ra>
// kernel: tpu_custom_call.1
= control target key start
LH: loop header
LB: loop body
LE: loop exit
PB: predicated region body
PF: predicated region fallthrough
CT: control target
= control target key end

     0   :  { %8 = vsyncpa [#allocation3], 0  ;;  %s307_s0 = inlined_call_operand.hbm [shape: f32[16,128], index: 0, kind: input, shape index: {}]   ;;  %s308_s1 = inlined_call_operand.hbm [shape: f32[1,128], index: 1, kind: input, shape index: {}]   ;;  %s309_s2 = inlined_call_operand.vmem [shape: f32[1,128], index: 2, kind: input, shape index: {}]   ;;  %s310_s3 = inlined_call_operand.hbm [shape: f32[16,128], index: 3, kind: output, shape index: {}]  }
   0x1   :  { %9 = vsyncpa [#allocation6], 0 }
   0x2   :  { %10 = vsyncpa [#allocation4], 0  ;;  %s15_s14 = sshll.u32 %s307_s0, 4  ;;  %s258_s15 = smov [#allocation2]   ;;  %s16_s14 = int_to_ptr.hbm [resolvable:$true] %s15_s14 }
   0x3   :  { %s17_s16 = sshll.u32 %s258_s15, 4  ;;  %s29_s19 = sshll.u32 %s308_s1, 4  ;;  %s18_s16 = int_to_ptr.vmem [resolvable:$true] %s17_s16  ;;  %s30_s19 = int_to_ptr.hbm [resolvable:$true] %s29_s19 }
   0x4   :  { %s259_s20 = smov 128   ;;  %s260_s21 = smov 8  }
   0x5   :  { %23 = dma.hbm_to_vmem [thread:$0]  %s16_s14, 256, %s18_s16, [#allocation3], %s259_s20, %s259_s20, %s260_s21  }
   0x6   :  { %s261_s22 = smov [#allocation5]  }
   0x7   :  { %s31_s23 = sshll.u32 %s261_s22, 4  ;;  %s32_s23 = int_to_ptr.vmem [resolvable:$true] %s31_s23 }
   0x8   :  { %34 = dma.hbm_to_vmem [thread:$0]  %s30_s19, 16, %s32_s23, [#allocation6]  }
   0x9   :  { %252 = dma.done.wait [#allocation3], 256  }
   0xa   :  { %253 = vsyncadd [#allocation3], 4294967040 }
   0xb   :  { %254 = dma.done.wait [#allocation6], 16  }
   0xc   :  { %255 = vsyncadd [#allocation6], 4294967280  ;;  %v45_v0 = vld [vmem:[#allocation2] sm:$0xff]  ;;  %v46_v1 = vld [vmem:[#allocation2 + $0x8] sm:$0xff]  ;;  %v262_v2 = vmov 128.0   ;;  %s263_s24 = smov [#allocation7]  }
   0xd   :  { %47 = vadd.xlane.f32.xlu0 %v45_v0  ;;  %170 = vrcp.f32 %v262_v2  ;;  %v168_v54 = vld [vmem:[#allocation5] ss:$0 sm:$0xff]  ;;  %v169_v58 = vld [vmem:[%s309_s2] ss:$0 sm:$0xff]  ;;  %s146_s25 = sshll.u32 %s263_s24, 4  ;;  %s148_s27 = sshll.u32 %s310_s3, 4  ;;  %s147_s25 = int_to_ptr.vmem [resolvable:$true] %s146_s25  ;;  %s149_s27 = int_to_ptr.hbm [resolvable:$true] %s148_s27 }
  0x13   :  { %v171_v3 = vpop.eup %170 }
  0x14   :  { %v52_v4 = vmul.f32 128.0, %v171_v3  ;;  %vm56_vm0 = vweird.f32 %v171_v3 }
  0x15   :  { %49 = vadd.xlane.f32.xlu0 %v46_v1 }
  0x16   :  { %v53_v5 = vsub.f32 1.0, %v52_v4 }
  0x18   :  { %v54_v6 = vmul.f32 %v171_v3, %v53_v5 }
  0x1a   :  { %v55_v7 = vadd.f32 %v171_v3, %v54_v6 }
  0x1c   :  { %v57_v8 = vsel %vm56_vm0, %v171_v3, %v55_v7 }
  0x80   :  { %v48_v9 = vpop.xlane.xlu0 %47 }
  0x81   :  { %v58_v10 = vmul.f32 %v57_v8, %v48_v9 }
  0x83   :  { %v60_v11 = vsub.f32 %v45_v0, %v58_v10 }
  0x85   :  { %v62_v12 = vmul.f32 %v60_v11, %v60_v11 }
  0x87   :  { %64 = vadd.xlane.f32.xlu1 %v62_v12 }
  0x88   :  { %v50_v13 = vpop.xlane.xlu0 %49 }
  0x89   :  { %v59_v14 = vmul.f32 %v57_v8, %v50_v13 }
  0x8b   :  { %v293_v15 = vsub.f32 %v46_v1, %v59_v14 }
  0x8d   :  { %v63_v16 = vmul.f32 %v293_v15, %v293_v15 }
  0x8f   :  { %66 = vadd.xlane.f32.xlu1 %v63_v16 }
  0xfa   :  { %v65_v17 = vpop.xlane.xlu1 %64 }
  0xfb   :  { %v68_v18 = vmul.f32 %v65_v17, %v57_v8 }
  0xfd   :  { %172 = vrsqrt.f32 %v68_v18  ;;  %vm77_vm1 = vcmp.eq.f32.partialorder %v68_v18, inf  ;;  %v80_v31 = vand.u32 2147483648, %v68_v18  ;;  %vm79_vm2 = vcmp.eq.f32.partialorder %v68_v18, 0.0 }
 0x102   :  { %v67_v19 = vpop.xlane.xlu1 %66 }
 0x103   :  { %v173_v20 = vpop.eup %172  ;;  %v69_v21 = vmul.f32 %v67_v19, %v57_v8 }
 0x104   :  { %v71_v22 = vmul.f32 %v173_v20, %v68_v18 }
 0x105   :  { %174 = vrsqrt.f32 %v69_v21  ;;  %vm89_vm3 = vcmp.eq.f32.partialorder %v69_v21, inf  ;;  %v92_v39 = vand.u32 2147483648, %v69_v21  ;;  %vm91_vm4 = vcmp.eq.f32.partialorder %v69_v21, 0.0 }
 0x106   :  { %v72_v23 = vmul.f32 %v173_v20, %v71_v22 }
 0x108   :  { %v73_v24 = vmul.f32 0.5, %v72_v23 }
 0x10a   :  { %v74_v25 = vsub.f32 1.5, %v73_v24 }
 0x10b   :  { %v175_v26 = vpop.eup %174 }
 0x10c   :  { %v75_v27 = vmul.f32 %v173_v20, %v74_v25  ;;  %v83_v28 = vmul.f32 %v175_v26, %v69_v21 }
 0x10e   :  { %v76_v29 = vmul.f32 %v75_v27, %v68_v18  ;;  %v84_v30 = vmul.f32 %v175_v26, %v83_v28 }
 0x110   :  { %v78_v32 = vsel %vm77_vm1, %v68_v18, %v76_v29  ;;  %v85_v33 = vmul.f32 0.5, %v84_v30 }
 0x111   :  { %v81_v34 = vsel %vm79_vm2, %v80_v31, %v78_v32 }
 0x112   :  { %v94_v35 = vadd.f32 1e-05, %v81_v34  ;;  %v86_v36 = vsub.f32 1.5, %v85_v33 }
 0x114   :  { %176 = vrcp.f32 %v94_v35  ;;  %v87_v37 = vmul.f32 %v175_v26, %v86_v36  ;;  %v107_v46 = vand.u32 2147483648, %v94_v35  ;;  %v105_v48 = vand.u32 2147483647, %v94_v35 }
 0x115   :  { %vm101_vm6 = vweird.f32 %v94_v35 }
 0x116   :  { %v88_v38 = vmul.f32 %v87_v37, %v69_v21  ;;  %v108_v51 = vor.u32 1.1754944e-38, %v107_v46  ;;  %vm106_vm8 = vcmp.eq.f32.partialorder %v105_v48, 8.507059e+37 }
 0x118   :  { %v90_v40 = vsel %vm89_vm3, %v69_v21, %v88_v38 }
 0x119   :  { %v93_v41 = vsel %vm91_vm4, %v92_v39, %v90_v40 }
 0x11a   :  { %v177_v42 = vpop.eup %176  ;;  %v95_v43 = vadd.f32 1e-05, %v93_v41 }
 0x11b   :  { %v97_v44 = vmul.f32 %v177_v42, %v94_v35  ;;  %vm102_vm5 = vweird.f32 %v177_v42 }
 0x11c   :  { %178 = vrcp.f32 %v95_v43  ;;  %vm103_vm7 = vmor %vm101_vm6, %vm102_vm5  ;;  %v122_v59 = vand.u32 2147483648, %v95_v43  ;;  %v120_v61 = vand.u32 2147483647, %v95_v43  ;;  %vm116_vm10 = vweird.f32 %v95_v43 }
 0x11d   :  { %v98_v45 = vsub.f32 1.0, %v97_v44 }
 0x11e   :  { %v123_v1 = vor.u32 1.1754944e-38, %v122_v59  ;;  %vm121_vm12 = vcmp.eq.f32.partialorder %v120_v61, 8.507059e+37 }
 0x11f   :  { %v99_v47 = vmul.f32 %v177_v42, %v98_v45 }
 0x121   :  { %v100_v49 = vadd.f32 %v177_v42, %v99_v47 }
 0x122   :  { %v179_v50 = vpop.eup %178 }
 0x123   :  { %v104_v52 = vsel %vm103_vm7, %v177_v42, %v100_v49  ;;  %v112_v53 = vmul.f32 %v179_v50, %v95_v43  ;;  %vm117_vm9 = vweird.f32 %v179_v50 }
 0x124   :  { %v109_v55 = vsel %vm106_vm8, %v108_v51, %v104_v52  ;;  %vm118_vm11 = vmor %vm116_vm10, %vm117_vm9 }
 0x125   :  { %v113_v56 = vsub.f32 1.0, %v112_v53  ;;  %v128_v57 = vmul.f32 %v109_v55, %v60_v11 }
 0x127   :  { %v114_v60 = vmul.f32 %v179_v50, %v113_v56  ;;  %v133_v62 = vmul.f32 %v168_v54, %v128_v57 }
 0x129   :  { %v115_v63 = vadd.f32 %v179_v50, %v114_v60  ;;  %v138_v0 = vadd.f32 %v169_v58, %v133_v62 }
 0x12b   :  { %v119_v2 = vsel %vm118_vm11, %v179_v50, %v115_v63  ;;  %140 = vst [vmem:[#allocation7] sm:$0xff] %v138_v0 }
 0x12c   :  { %v124_v3 = vsel %vm121_vm12, %v123_v1, %v119_v2 }
 0x12d   :  { %v129_v4 = vmul.f32 %v124_v3, %v293_v15 }
 0x12f   :  { %v134_v5 = vmul.f32 %v168_v54, %v129_v4 }
 0x131   :  { %v139_v6 = vadd.f32 %v169_v58, %v134_v5 }
 0x133   :  { %141 = vst [vmem:[#allocation7 + $0x8] sm:$0xff] %v139_v6 }
 0x134   :  { %154 = dma.vmem_to_hbm [thread:$0]  %s147_s25, 256, %s149_s27, [#allocation4], %s259_s20, %s259_s20, %s260_s21  }
 0x135   :  { %256 = dma.done.wait [#allocation4], 256  }
 0x136   :  { %257 = vsyncadd [#allocation4], 4294967040 }
 0x137   :  { %159 = vsyncpa [#allocation3], 1 }
 0x138   :  { %160 = vsyncpa [#allocation6], 1 }
 0x139   :  { %161 = vsyncpa [#allocation4], 1 }

</bundles_post_ra>
